<compile_context>
chip_gen: v7x
topology: tpu7x:2x2x1
jax: 0.10.0
libtpu: 0.0.40
codegen_flags: <defaults>
</compile_context>

<pallas_src>
import jax
import jax.numpy as jnp
from jax.experimental import pallas as pl
from jax.experimental.pallas import tpu as pltpu


def _in_batch_neg_loss_kernel(q_ref, dk_ref, out_ref, m_ref, l_ref, diag_ref):
    i = pl.program_id(0)
    j = pl.program_id(1)
    nj = pl.num_programs(1)
    tq = q_ref.shape[0]
    td = dk_ref.shape[0]

    @pl.when(j == 0)
    def _():
        m_ref[...] = jnp.full_like(m_ref, -jnp.inf)
        l_ref[...] = jnp.zeros_like(l_ref)
        diag_ref[...] = jnp.zeros_like(diag_ref)

    # [tq, td] logits on the MXU. Contract the feature dim of both operands
    # directly (no in-kernel transpose); accumulate in f32.
    sim = jax.lax.dot_general(
        q_ref[...], dk_ref[...],
        dimension_numbers=(((1,), (1,)), ((), ())),
        preferred_element_type=jnp.float32)

    # Online (streaming) logsumexp over the doc ("class") axis.
    m_prev = m_ref[...]
    m_new = jnp.maximum(m_prev, jnp.max(sim, axis=-1, keepdims=True))
    alpha = jnp.exp(m_prev - m_new)                       # == 0 on first step
    l_ref[...] = alpha * l_ref[...] + jnp.sum(jnp.exp(sim - m_new),
                                              axis=-1, keepdims=True)
    m_ref[...] = m_new

    # Label logit sim[r, r] (global indices), taken straight from the f32 MXU
    # tile. Only blocks that intersect the global diagonal do the compare /
    # masked row-sum; works for any tq, td (diagonal may span several doc
    # tiles).
    q0 = i * tq
    d0 = j * td

    @pl.when(jnp.logical_and(q0 < d0 + td, d0 < q0 + tq))
    def _():
        row_g = q0 + jax.lax.broadcasted_iota(jnp.int32, (tq, td), 0)
        col_g = d0 + jax.lax.broadcasted_iota(jnp.int32, (tq, td), 1)
        hit = row_g == col_g
        diag_ref[...] += jnp.sum(jnp.where(hit, sim, 0.0),
                                 axis=-1, keepdims=True)

    @pl.when(j == nj - 1)
    def _():
        # per-row cross-entropy: lse - label_logit
        out_ref[...] = m_ref[...] + jnp.log(l_ref[...]) - diag_ref[...]


_VMEM_BUDGET = 44 * 1024 * 1024      # tile budget: headroom under v7x 64 MiB
_VMEM_LIMIT_CAP = 56 * 1024 * 1024   # scoped-VMEM limit cap (safe on all gens)


def _tile_candidates(b, cap):
    """Tile sizes that divide b and satisfy the (8,128) rule (or == b)."""
    cands = set()
    if b <= cap:
        cands.add(b)                  # full-extent block is always legal
    t = 8
    while t <= min(b, cap):
        if b % t == 0:
            cands.add(t)
        t *= 2
    if not cands:
        cands.add(b)                  # odd / small batch: single full block
    return sorted(cands, reverse=True)


def _vmem_usage(tq, td, dim, itemsize):
    in_bufs = 2 * (tq + td) * dim * itemsize   # double-buffered input tiles
    sim_tmp = 3 * tq * td * 4                  # sim / exp / mask temporaries
    small = 5 * tq * 4                         # out (x2 buffers) + 3 scratch
    return in_bufs + sim_tmp + small


def _pick_tiles(b, dim, itemsize, target=512):
    """Pick (tq, td): grow tq first (doc stream is re-read once per query
    tile, so arithmetic intensity ~ tq flops/byte); shrink td first under
    VMEM pressure."""
    cands = _tile_candidates(b, max(target, 8))
    for tq in cands:
        for td in cands:
            if td > tq:
                continue
            if _vmem_usage(tq, td, dim, itemsize) <= _VMEM_BUDGET:
                return tq, td
    smallest = cands[-1]
    return smallest, smallest


def in_batch_negative_loss(query_vectors, doc_vectors, *, tq=None, td=None,
                           matmul_in_bf16=True):
    """Pallas TPU implementation of InBatchNegativeLoss.forward."""
    assert query_vectors.shape == doc_vectors.shape
    assert query_vectors.ndim == 2
    b, dim = query_vectors.shape

    # MXU is natively bf16; f32 x f32 runs as a slow multi-pass emulation and
    # doubles HBM bytes per tile. Accumulation / softmax / loss stay f32.
    if matmul_in_bf16 and query_vectors.dtype == jnp.float32:
        query_vectors = query_vectors.astype(jnp.bfloat16)
        doc_vectors = doc_vectors.astype(jnp.bfloat16)

    itemsize = jnp.dtype(query_vectors.dtype).itemsize
    auto_tq, auto_td = _pick_tiles(b, dim, itemsize)
    tq = auto_tq if tq is None else tq
    td = auto_td if td is None else td
    assert b % tq == 0 and b % td == 0, (b, tq, td)
    # TODO(synk): ragged batches (b not divisible by any legal tile) fall back
    # to a single full-size block rather than a masked final tile.

    grid = (b // tq, b // td)
    usage = _vmem_usage(tq, td, dim, itemsize)
    vmem_limit = int(min(_VMEM_LIMIT_CAP, max(32 * 1024 * 1024, 2 * usage)))

    cost = pl.CostEstimate(
        flops=2 * b * b * dim,
        transcendentals=b * b + b,
        # docs are re-streamed once per query tile; queries once; tiny output.
        bytes_accessed=(b // tq) * b * dim * itemsize
        + b * dim * itemsize + b * 4,
    )

    per_row = pl.pallas_call(
        _in_batch_neg_loss_kernel,
        out_shape=jax.ShapeDtypeStruct((b, 1), jnp.float32),
        grid_spec=pltpu.PrefetchScalarGridSpec(
            num_scalar_prefetch=0,
            grid=grid,
            in_specs=[
                # query tile [tq, D]
                pl.BlockSpec((tq, dim), lambda i, j: (i, 0)),
                # doc ("classes") tile [td, D] -- reduction axis j
                # (sweep pipeline_mode=pl.Buffered(3) here if a profile shows
                #  exposed DMA latency and VMEM headroom exists)
                pl.BlockSpec((td, dim), lambda i, j: (j, 0)),
            ],
            out_specs=pl.BlockSpec((tq, 1), lambda i, j: (i, 0)),
            scratch_shapes=[
                pltpu.VMEM((tq, 1), jnp.float32),   # running max
                pltpu.VMEM((tq, 1), jnp.float32),   # running sum(exp)
                pltpu.VMEM((tq, 1), jnp.float32),   # diagonal (label) logit
            ],
        ),
        compiler_params=pltpu.CompilerParams(
            dimension_semantics=("parallel", "arbitrary"),
            vmem_limit_bytes=vmem_limit),
        cost_estimate=cost,
    )(query_vectors, doc_vectors)

    # Tiny [B,1] reduction; 1/B applied once here (mean reduction).
    return jnp.mean(per_row)


def _reference_loss(query_vectors, doc_vectors):
    sim = (query_vectors.astype(jnp.float32)
           @ doc_vectors.astype(jnp.float32).T)
    logp = jax.nn.log_softmax(sim, axis=-1)
    idx = jnp.arange(sim.shape[0])
    return -jnp.mean(logp[idx, idx])


if __name__ == "__main__":
    key = jax.random.PRNGKey(0)
    kq, kd = jax.random.split(key)

    # Case 1: exact f32 matmul path, single full tile (batch=8, dim=32).
    q = jax.random.normal(kq, (8, 32), dtype=jnp.float32)
    d = jax.random.normal(kd, (8, 32), dtype=jnp.float32)
    loss = jax.block_until_ready(
        in_batch_negative_loss(q, d, matmul_in_bf16=False))
    ref = jax.block_until_ready(_reference_loss(q, d))
    assert jnp.allclose(loss, ref, rtol=1e-5, atol=1e-5), (loss, ref)

    # Case 2: tiled online-softmax + diag-from-sim path (2x2 grid), exact f32.
    q2 = jax.random.normal(kq, (16, 32), dtype=jnp.float32)
    d2 = jax.random.normal(kd, (16, 32), dtype=jnp.float32)
    loss2 = jax.block_until_ready(
        in_batch_negative_loss(q2, d2, tq=8, td=8, matmul_in_bf16=False))
    ref2 = jax.block_until_ready(_reference_loss(q2, d2))
    assert jnp.allclose(loss2, ref2, rtol=1e-5, atol=1e-5), (loss2, ref2)

    # Case 3: rectangular tiles (tq != td): diagonal spans two doc tiles.
    q3 = jax.random.normal(kq, (16, 64), dtype=jnp.float32)
    d3 = jax.random.normal(kd, (16, 64), dtype=jnp.float32)
    loss3 = jax.block_until_ready(
        in_batch_negative_loss(q3, d3, tq=16, td=8, matmul_in_bf16=False))
    ref3 = jax.block_until_ready(_reference_loss(q3, d3))
    assert jnp.allclose(loss3, ref3, rtol=1e-5, atol=1e-5), (loss3, ref3)

    # Case 4: default bf16-matmul fast path; tight check against a
    # bf16-matched reference, loose check against the pure f32 reference.
    loss4 = jax.block_until_ready(in_batch_negative_loss(q2, d2))
    ref4_bf16 = jax.block_until_ready(
        _reference_loss(q2.astype(jnp.bfloat16), d2.astype(jnp.bfloat16)))
    ref4_f32 = jax.block_until_ready(_reference_loss(q2, d2))
    assert jnp.allclose(loss4, ref4_bf16, rtol=1e-4, atol=1e-4), (loss4, ref4_bf16)
    assert jnp.allclose(loss4, ref4_f32, rtol=5e-2, atol=5e-2), (loss4, ref4_f32)

    print("KERNEL_OK")
</pallas_src>

<mosaic_0001>
module attributes {stable_mosaic.version = 11 : i64} {
  func.func @_in_batch_neg_loss_kernel(%arg0: i32, %arg1: i32, %arg2: memref<8x32xf32, #tpu.memory_space<vmem>>, %arg3: memref<8x32xf32, #tpu.memory_space<vmem>>, %arg4: memref<8x1xf32, #tpu.memory_space<vmem>>, %arg5: memref<8x1xf32, #tpu.memory_space<vmem>>, %arg6: memref<8x1xf32, #tpu.memory_space<vmem>>, %arg7: memref<8x1xf32, #tpu.memory_space<vmem>>) attributes {dimension_semantics = [#tpu.dimension_semantics<parallel>, #tpu.dimension_semantics<arbitrary>], iteration_bounds = array<i64: 1, 1>, scalar_prefetch = 0 : i64, scratch_operands = 3 : i64, tpu.core_type = #tpu.core_type<tc>, window_params = [{transform_indices = @transform_0, window_bounds = array<i64: 8, 32>}, {transform_indices = @transform_1, window_bounds = array<i64: 8, 32>}, {transform_indices = @transform_2, window_bounds = array<i64: 8, 1>}]} {
    %c0_i32 = arith.constant 0 : i32
    %0 = arith.cmpi eq, %arg1, %c0_i32 : i32
    %1 = arith.extui %0 : i1 to i32
    %c0_i32_0 = arith.constant 0 : i32
    %2 = arith.cmpi ne, %1, %c0_i32_0 : i32
    scf.if %2 {
      %cst_20 = arith.constant 0xFF800000 : f32
      %34 = vector.broadcast %cst_20 : f32 to vector<8x1xf32>
      %c0_21 = arith.constant 0 : index
      %c0_22 = arith.constant 0 : index
      %35 = vector.load %arg5[%c0_21, %c0_22] : memref<8x1xf32, #tpu.memory_space<vmem>>, vector<8x1xf32>
      tpu.vector_store %arg5[%c0_21, %c0_22], %34 {strides = array<i32>} : memref<8x1xf32, #tpu.memory_space<vmem>>, vector<8x1xf32>,
      %cst_23 = arith.constant 0.000000e+00 : f32
      %36 = vector.broadcast %cst_23 : f32 to vector<8x1xf32>
      %c0_24 = arith.constant 0 : index
      %c0_25 = arith.constant 0 : index
      %37 = vector.load %arg6[%c0_24, %c0_25] : memref<8x1xf32, #tpu.memory_space<vmem>>, vector<8x1xf32>
      tpu.vector_store %arg6[%c0_24, %c0_25], %36 {strides = array<i32>} : memref<8x1xf32, #tpu.memory_space<vmem>>, vector<8x1xf32>,
      %cst_26 = arith.constant 0.000000e+00 : f32
      %38 = vector.broadcast %cst_26 : f32 to vector<8x1xf32>
      %c0_27 = arith.constant 0 : index
      %c0_28 = arith.constant 0 : index
      %39 = vector.load %arg7[%c0_27, %c0_28] : memref<8x1xf32, #tpu.memory_space<vmem>>, vector<8x1xf32>
      tpu.vector_store %arg7[%c0_27, %c0_28], %38 {strides = array<i32>} : memref<8x1xf32, #tpu.memory_space<vmem>>, vector<8x1xf32>,
    } else {
    }
    %c0 = arith.constant 0 : index
    %c0_1 = arith.constant 0 : index
    %3 = vector.load %arg2[%c0, %c0_1] : memref<8x32xf32, #tpu.memory_space<vmem>>, vector<8x32xf32>
    %c0_2 = arith.constant 0 : index
    %c0_3 = arith.constant 0 : index
    %4 = vector.load %arg3[%c0_2, %c0_3] : memref<8x32xf32, #tpu.memory_space<vmem>>, vector<8x32xf32>
    %cst = arith.constant dense<0.000000e+00> : vector<8x8xf32>
    %5 = tpu.matmul %3, %4, %cst {dimension_numbers = #tpu.dot_dimension_numbers<[1], [1], [0], [0], [0, 0, 1, 0], [], []>} : vector<8x32xf32>, vector<8x32xf32>, vector<8x8xf32> -> vector<8x8xf32>
    %c0_4 = arith.constant 0 : index
    %c0_5 = arith.constant 0 : index
    %6 = vector.load %arg5[%c0_4, %c0_5] : memref<8x1xf32, #tpu.memory_space<vmem>>, vector<8x1xf32>
    %cst_6 = arith.constant dense<0xFF800000> : vector<8xf32>
    %7 = vector.multi_reduction <maximumf>, %5, %cst_6 [1] : vector<8x8xf32> to vector<8xf32>
    %8 = vector.shape_cast %7 : vector<8xf32> to vector<8x1xf32>
    %9 = arith.maximumf %6, %8 : vector<8x1xf32>
    %10 = arith.subf %6, %9 : vector<8x1xf32>
    %11 = math.exp %10 : vector<8x1xf32>
    %c0_7 = arith.constant 0 : index
    %c0_8 = arith.constant 0 : index
    %12 = vector.load %arg6[%c0_7, %c0_8] : memref<8x1xf32, #tpu.memory_space<vmem>>, vector<8x1xf32>
    %13 = arith.mulf %11, %12 : vector<8x1xf32>
    %14 = vector.broadcast %9 : vector<8x1xf32> to vector<8x8xf32>
    %15 = arith.subf %5, %14 : vector<8x8xf32>
    %16 = math.exp %15 : vector<8x8xf32>
    %cst_9 = arith.constant dense<0.000000e+00> : vector<8xf32>
    %17 = vector.multi_reduction <add>, %16, %cst_9 [1] : vector<8x8xf32> to vector<8xf32>
    %18 = vector.shape_cast %17 : vector<8xf32> to vector<8x1xf32>
    %19 = arith.addf %13, %18 : vector<8x1xf32>
    %c0_10 = arith.constant 0 : index
    %c0_11 = arith.constant 0 : index
    %20 = vector.load %arg6[%c0_10, %c0_11] : memref<8x1xf32, #tpu.memory_space<vmem>>, vector<8x1xf32>
    tpu.vector_store %arg6[%c0_10, %c0_11], %19 {strides = array<i32>} : memref<8x1xf32, #tpu.memory_space<vmem>>, vector<8x1xf32>,
    %c0_12 = arith.constant 0 : index
    %c0_13 = arith.constant 0 : index
    %21 = vector.load %arg5[%c0_12, %c0_13] : memref<8x1xf32, #tpu.memory_space<vmem>>, vector<8x1xf32>
    tpu.vector_store %arg5[%c0_12, %c0_13], %9 {strides = array<i32>} : memref<8x1xf32, #tpu.memory_space<vmem>>, vector<8x1xf32>,
    %c8_i32 = arith.constant 8 : i32
    %22 = arith.muli %arg0, %c8_i32 : i32
    %c8_i32_14 = arith.constant 8 : i32
    %23 = arith.muli %arg1, %c8_i32_14 : i32
    %c8_i32_15 = arith.constant 8 : i32
    %24 = arith.addi %23, %c8_i32_15 : i32
    %25 = arith.cmpi slt, %22, %24 : i32
    %c8_i32_16 = arith.constant 8 : i32
    %26 = arith.addi %22, %c8_i32_16 : i32
    %27 = arith.cmpi slt, %23, %26 : i32
    %28 = arith.andi %25, %27 : i1
    %29 = arith.extui %28 : i1 to i32
    %c0_i32_17 = arith.constant 0 : i32
    %30 = arith.cmpi ne, %29, %c0_i32_17 : i32
    scf.if %30 {
      %34 = tpu.iota {dimensions = array<i32: 0>} : vector<8x8xi32>
      %35 = vector.broadcast %22 : i32 to vector<8x8xi32>
      %36 = arith.addi %35, %34 : vector<8x8xi32>
      %37 = tpu.iota {dimensions = array<i32: 1>} : vector<8x8xi32>
      %38 = vector.broadcast %23 : i32 to vector<8x8xi32>
      %39 = arith.addi %38, %37 : vector<8x8xi32>
      %40 = arith.cmpi eq, %36, %39 : vector<8x8xi32>
      %c0_20 = arith.constant 0 : index
      %c0_21 = arith.constant 0 : index
      %41 = vector.load %arg7[%c0_20, %c0_21] : memref<8x1xf32, #tpu.memory_space<vmem>>, vector<8x1xf32>
      %cst_22 = arith.constant 0.000000e+00 : f32
      %42 = vector.broadcast %cst_22 : f32 to vector<8x8xf32>
      %43 = arith.select %40, %5, %42 : vector<8x8xi1>, vector<8x8xf32>
      %cst_23 = arith.constant dense<0.000000e+00> : vector<8xf32>
      %44 = vector.multi_reduction <add>, %43, %cst_23 [1] : vector<8x8xf32> to vector<8xf32>
      %45 = vector.shape_cast %44 : vector<8xf32> to vector<8x1xf32>
      %46 = arith.addf %41, %45 : vector<8x1xf32>
      %c0_24 = arith.constant 0 : index
      %c0_25 = arith.constant 0 : index
      %47 = vector.load %arg7[%c0_24, %c0_25] : memref<8x1xf32, #tpu.memory_space<vmem>>, vector<8x1xf32>
      tpu.vector_store %arg7[%c0_24, %c0_25], %46 {strides = array<i32>} : memref<8x1xf32, #tpu.memory_space<vmem>>, vector<8x1xf32>,
    } else {
    }
    %c0_i32_18 = arith.constant 0 : i32
    %31 = arith.cmpi eq, %arg1, %c0_i32_18 : i32
    %32 = arith.extui %31 : i1 to i32
    %c0_i32_19 = arith.constant 0 : i32
    %33 = arith.cmpi ne, %32, %c0_i32_19 : i32
    scf.if %33 {
      %c0_20 = arith.constant 0 : index
      %c0_21 = arith.constant 0 : index
      %34 = vector.load %arg5[%c0_20, %c0_21] : memref<8x1xf32, #tpu.memory_space<vmem>>, vector<8x1xf32>
      %c0_22 = arith.constant 0 : index
      %c0_23 = arith.constant 0 : index
      %35 = vector.load %arg6[%c0_22, %c0_23] : memref<8x1xf32, #tpu.memory_space<vmem>>, vector<8x1xf32>
      %36 = math.log %35 : vector<8x1xf32>
      %37 = arith.addf %34, %36 : vector<8x1xf32>
      %c0_24 = arith.constant 0 : index
      %c0_25 = arith.constant 0 : index
      %38 = vector.load %arg7[%c0_24, %c0_25] : memref<8x1xf32, #tpu.memory_space<vmem>>, vector<8x1xf32>
      %39 = arith.subf %37, %38 : vector<8x1xf32>
      %c0_26 = arith.constant 0 : index
      %c0_27 = arith.constant 0 : index
      %40 = vector.load %arg4[%c0_26, %c0_27] : memref<8x1xf32, #tpu.memory_space<vmem>>, vector<8x1xf32>
      tpu.vector_store %arg4[%c0_26, %c0_27], %39 {strides = array<i32>} : memref<8x1xf32, #tpu.memory_space<vmem>>, vector<8x1xf32>,
    } else {
    }
    return
  }
  func.func @transform_0(%arg0: i32, %arg1: i32) -> (i32, i32) {
    %c0_i32 = arith.constant 0 : i32
    %c0_i32_0 = arith.constant 0 : i32
    return %arg0, %c0_i32 : i32, i32
  }
  func.func @transform_1(%arg0: i32, %arg1: i32) -> (i32, i32) {
    %c0_i32 = arith.constant 0 : i32
    %c0_i32_0 = arith.constant 0 : i32
    return %arg1, %c0_i32 : i32, i32
  }
  func.func @transform_2(%arg0: i32, %arg1: i32) -> (i32, i32) {
    %c0_i32 = arith.constant 0 : i32
    %c0_i32_0 = arith.constant 0 : i32
    return %arg0, %c0_i32 : i32, i32
  }
}

</mosaic_0001>

<bundles_post_ra>
// kernel: tpu_custom_call.1
= control target key start
LH: loop header
LB: loop body
LE: loop exit
PB: predicated region body
PF: predicated region fallthrough
CT: control target
= control target key end

     0   :  { %7 = vsyncpa [#allocation6], 0  ;;  %s319_s0 = inlined_call_operand.hbm [shape: f32[8,32], index: 0, kind: input, shape index: {}]   ;;  %s320_s1 = inlined_call_operand.hbm [shape: f32[8,32], index: 1, kind: input, shape index: {}]   ;;  %s321_s2 = inlined_call_operand.vmem [shape: f32[8,1], index: 2, kind: output, shape index: {}]  }
   0x1   :  { %8 = vsyncpa [#allocation8], 0  ;;  %s261_s9 = smov [#allocation5]   ;;  %s262_s11 = smov [#allocation7]  }
   0x2   :  { %s15_s10 = sshll.u32 %s261_s9, 4  ;;  %s25_s12 = sshll.u32 %s262_s11, 4  ;;  %s16_s10 = int_to_ptr.vmem [resolvable:$true] %s15_s10  ;;  %s26_s12 = int_to_ptr.vmem [resolvable:$true] %s25_s12 }
   0x3   :  { %s213_s15 = scalar_lea.hbm %s319_s0, 128 }
   0x4   :  { %p214_p0 = scmp.ne.s32.totalorder %s319_s0, %s213_s15  ;;  %p217_p1 = scmp.lt.u32.totalorder %s213_s15, %s319_s0 }
   0x6   :  { %p219_p2 = pnand %p217_p1, %p214_p0 }
   0x8   :  { %222 = shalt.err (!%p219_p2)
}
   0x9   :  { %s223_s20 = scalar_lea.vmem %s16_s10, 128  ;;  %p228_p4 = scmp.lt.s32.totalorder %s16_s10, %s16_s10 }
   0xa   :  { %p224_p3 = scmp.ne.s32.totalorder %s16_s10, %s223_s20  ;;  %p229_p5 = scmp.lt.s32.totalorder %s223_s20, %s223_s20 }
   0xc   :  { %p230_p6 = por %p229_p5, %p228_p4 }
   0xe   :  { %p231_p7 = pnand %p230_p6, %p224_p3 }
  0x10   :  { %234 = shalt.err (!%p231_p7)
}
  0x11   :  { %18 = dma.hbm_to_vmem [thread:$0]  %s319_s0, 128, %s16_s10, [#allocation6]  }
  0x12   :  { %s235_s25 = scalar_lea.hbm %s320_s1, 128 }
  0x13   :  { %p236_p8 = scmp.ne.s32.totalorder %s320_s1, %s235_s25  ;;  %p239_p9 = scmp.lt.u32.totalorder %s235_s25, %s320_s1 }
  0x15   :  { %p241_p10 = pnand %p239_p9, %p236_p8 }
  0x17   :  { %244 = shalt.err (!%p241_p10)
}
  0x18   :  { %s245_s30 = scalar_lea.vmem %s26_s12, 128  ;;  %p250_p12 = scmp.lt.s32.totalorder %s26_s12, %s26_s12 }
  0x19   :  { %p246_p11 = scmp.ne.s32.totalorder %s26_s12, %s245_s30  ;;  %p251_p13 = scmp.lt.s32.totalorder %s245_s30, %s245_s30 }
  0x1b   :  { %p252_p0 = por %p251_p13, %p250_p12 }
  0x1d   :  { %p253_p1 = pnand %p252_p0, %p246_p11 }
  0x1f   :  { %256 = shalt.err (!%p253_p1)
}
  0x20   :  { %28 = dma.hbm_to_vmem [thread:$0]  %s320_s1, 128, %s26_s12, [#allocation8]  }
  0x21   :  { %257 = dma.done.wait [#allocation6], 128  }
  0x22   :  { %258 = vsyncadd [#allocation6], 4294967168 }
  0x23   :  { %259 = dma.done.wait [#allocation8], 128  }
  0x24   :  { %260 = vsyncadd [#allocation8], 4294967168  ;;  %vm39_vm0 = vcmask 7168   ;;  %v263_v0 = vmov 0.0   ;;  %vm264_vm1 = vmmov 0   ;;  %vm45_vm2 = vcmask 261120  }
  0x25   :  { %41 = vst.msk [vmem:[#allocation3] sm:$0xff] %vm39_vm0, %v263_v0  ;;  %42 = vst.msk [vmem:[#allocation4] sm:$0xff] %vm39_vm0, %v263_v0  ;;  %195 = vmatprep.subr.mxu0 %v263_v0  ;;  %197 = vmatprep.mubr.msk.f32.mxu0 %vm264_vm1, %v263_v0  ;;  %v44_v1 = vld [vmem:[#allocation7] sm:$0xff]  ;;  %v43_v2 = vld [vmem:[#allocation5] sm:$0xff]  ;;  %v265_v3 = vmov -inf   ;;  %vm123_vm3 = vcmask 64512   ;;  %v158_v15 = vlaneseq }
  0x26   :  { %196 = vmatpush3.xpose.msk.msra.mxu0 %vm45_vm2, %v44_v1  ;;  %40 = vst.msk [vmem:[#allocation2] sm:$0xff] %vm39_vm0, %v265_v3  ;;  %v266_v7 = vmov 0  }
  0x27   :  { %206 = vset.pattern.permute.xlu0 %v266_v7  ;;  %v159_v16 = vshrl.u32 %v158_v15, 7  ;;  %v163_v17 = vand.u32 127, %v158_v15 }
  0x29   :  { %198 = vmatmul.mubr.msk.f32.vlgmr.msra.gmra.mrb[0].mxu0 %vm45_vm2, %v43_v2  ;;  %vm166_vm4 = vcmp.eq.s32.totalorder %v159_v16, %v163_v17 }
  0x2c   :  { %v131_v24 = vld [vmem:[#allocation3] sm:$0xff]  ;;  %v167_v28 = vld [vmem:[#allocation4] sm:$0xff] }
  0x2d   :  { %v122_v8 = vld [vmem:[#allocation2] sm:$0xff] }
  0xfc   :  { %v118_v4 = vpop.f32.mrb[0].mxu0 }
  0xfd   :  { %v199_v5 = vpop.f32.mrb[1].mxu0  ;;  %v124_v6 = vsel %vm123_vm3, %v118_v4, -inf  ;;  %v168_v20 = vsel %vm166_vm4, %v118_v4, 0.0 }
  0xfe   :  { %125 = vmax.xlane.f32.xlu0 %v124_v6  ;;  %v169_v21 = vsel %vm123_vm3, %v168_v20, 0.0 }
 0x18b   :  { %v126_v9 = vpop.xlane.xlu0 %125 }
 0x18c   :  { %v127_v10 = vmax.f32 %v122_v8, %v126_v9 }
 0x18e   :  { %v128_v11 = vsub.f32 %v122_v8, %v127_v10  ;;  %147 = vst.msk [vmem:[#allocation2] sm:$0xff] %vm39_vm0, %v127_v10  ;;  %135 = vperm.xlu0 %206, %v127_v10  }
 0x190   :  { %v129_v22 = vmul.f32 1.442695, %v128_v11 }
 0x195   :  { %v177_v34 = vld [vmem:[#allocation2] sm:$0xff] }
 0x20d   :  { %v136_v12 = vpop.permute.xlu0 %135 }
 0x20e   :  { %v138_v13 = vsub.f32 %v118_v4, %v136_v12 }
 0x210   :  { %v139_v14 = vmul.f32 1.442695, %v138_v13 }
 0x212   :  { %207 = vpow2.f32 %v139_v14 }
 0x213   :  { %209 = vpow2.f32 %v129_v22 }
 0x21c   :  { %v208_v18 = vpop.eup %207 }
 0x21d   :  { %v141_v19 = vsel %vm123_vm3, %v208_v18, 0.0  ;;  %v210_v23 = vpop.eup %209 }
 0x21e   :  { %142 = vadd.xlane.f32.xlu1 %v141_v19  ;;  %v132_v25 = vmul.f32 %v210_v23, %v131_v24 }
 0x222   :  { %170 = vadd.xlane.f32.xlu1 %v169_v21 }
 0x2ab   :  { %v143_v26 = vpop.xlane.xlu1 %142 }
 0x2ac   :  { %v144_v27 = vadd.f32 %v143_v26, %v132_v25 }
 0x2ae   :  { %146 = vst.msk [vmem:[#allocation3] sm:$0xff] %vm39_vm0, %v144_v27 }
 0x2af   :  { %v171_v29 = vpop.xlane.xlu1 %170 }
 0x2b0   :  { %v172_v30 = vadd.f32 %v171_v29, %v167_v28 }
 0x2b2   :  { %173 = vst.msk [vmem:[#allocation4] sm:$0xff] %vm39_vm0, %v172_v30 }
 0x2b5   :  { %v178_v31 = vld [vmem:[#allocation3] sm:$0xff] }
 0x2b6   :  { %211 = vlog2.f32 %v178_v31 }
 0x2b9   :  { %v182_v36 = vld [vmem:[#allocation4] sm:$0xff] }
 0x2c0   :  { %v212_v32 = vpop.eup %211 }
 0x2c1   :  { %v180_v33 = vmul.f32 0.6931472, %v212_v32 }
 0x2c3   :  { %v181_v35 = vadd.f32 %v180_v33, %v177_v34 }
 0x2c5   :  { %v183_v37 = vsub.f32 %v181_v35, %v182_v36 }
 0x2c7   :  { %184 = vst.msk [vmem:[%s321_s2] sm:$0xff] %vm39_vm0, %v183_v37 }
 0x2c8   :  { %189 = vsyncpa [#allocation6], 1 }
 0x2c9   :  { %190 = vsyncpa [#allocation8], 1 }

</bundles_post_ra>
